<compile_context>
chip_gen: v6e
topology: v6e:2x2x1
jax: 0.10.0
libtpu: 0.0.40
codegen_flags: <defaults>
</compile_context>

<pallas_src>
import jax
import jax.numpy as jnp
import numpy as np
from jax.experimental import pallas as pl
from jax.experimental.pallas import tpu as pltpu


def _round_up(x, m):
    return ((x + m - 1) // m) * m


def odom_pose_kernel(params_ref, init_ref, out_ref):
    # params_ref: (8, TB)   rows 0-3 = quaternion, rows 4-6 = translation, row 7 pad.
    # init_ref:   (16, TB)  row-major flattened init_c2w, pose on the lane axis.
    # out_ref:    (16, TB)  row-major flattened c2w, pose on the lane axis.
    p = params_ref[...]          # (8, TB)
    m = init_ref[...]            # (16, TB)

    qr = p[0:1, :]
    qi = p[1:2, :]
    qj = p[2:3, :]
    qk = p[3:4, :]
    tx = p[4:5, :]
    ty = p[5:6, :]
    tz = p[6:7, :]

    # two_s = 2 / ||q||^2  -- reciprocal goes to the (otherwise idle) EUP slot.
    two_s = 2.0 * pl.reciprocal(qr * qr + qi * qi + qj * qj + qk * qk, approx=False)

    # rotation entries (same formulas as quad2rotation), each (1, TB)
    r00 = 1.0 - two_s * (qj * qj + qk * qk)
    r01 = two_s * (qi * qj - qk * qr)
    r02 = two_s * (qi * qk + qj * qr)
    r10 = two_s * (qi * qj + qk * qr)
    r11 = 1.0 - two_s * (qi * qi + qk * qk)
    r12 = two_s * (qj * qk - qi * qr)
    r20 = two_s * (qi * qk - qj * qr)
    r21 = two_s * (qj * qk + qi * qr)
    r22 = 1.0 - two_s * (qi * qi + qj * qj)

    # init_c2w rows in the transposed layout: m_j[l, :] == init_c2w[:, j, l], (4, TB).
    m0 = m[0:4, :]
    m1 = m[4:8, :]
    m2 = m[8:12, :]
    m3 = m[12:16, :]

    # c2w = RT @ init_c2w, row by row; (1, TB) coefficients broadcast over sublanes
    # (pure VPU work, batch vectorized along the 128-wide lane axis).
    row0 = r00 * m0 + r01 * m1 + r02 * m2 + tx * m3
    row1 = r10 * m0 + r11 * m1 + r12 * m2 + ty * m3
    row2 = r20 * m0 + r21 * m1 + r22 * m2 + tz * m3
    # homogeneous row [0,0,0,1] @ init_c2w == init_c2w row 3  -> row3 = m3

    # One lane-dense, full-block (unmasked) store; concat is along the sublane axis.
    out_ref[...] = jnp.concatenate([row0, row1, row2, m3], axis=0)


def _odom_pose_pallas(r, t, init_c2w, *, tb=8192):
    """Pallas path. r: (B,4), t: (B,3), init_c2w: (B,4,4).  Returns (B,4,4) float32."""
    B = r.shape[0]
    tb_eff = min(tb, _round_up(B, 128))        # lane tile, multiple of 128
    Bp = _round_up(B, tb_eff)                  # padded batch

    r = r.astype(jnp.float32)
    t = t.astype(jnp.float32)
    init_c2w = init_c2w.astype(jnp.float32)

    # Pack quaternion + translation into one lane-dense (8, Bp) array.
    params = jnp.zeros((8, Bp), jnp.float32).at[0, :].set(1.0)   # unit quat in pad lanes
    params = params.at[0:4, :B].set(r.T)
    params = params.at[4:7, :B].set(t.T)

    # (B, 4, 4) -> (16, Bp): row-major flatten, pose on the lane axis.
    init_flat = jnp.zeros((16, Bp), jnp.float32).at[:, :B].set(init_c2w.reshape(B, 16).T)

    grid = (Bp // tb_eff,)
    out_flat = pl.pallas_call(
        odom_pose_kernel,
        out_shape=jax.ShapeDtypeStruct((16, Bp), jnp.float32),
        grid_spec=pltpu.PrefetchScalarGridSpec(
            num_scalar_prefetch=0,
            grid=grid,
            in_specs=[
                pl.BlockSpec((8, tb_eff), lambda i: (0, i)),    # packed params
                pl.BlockSpec((16, tb_eff), lambda i: (0, i)),   # init_c2w (flattened.T)
            ],
            out_specs=pl.BlockSpec((16, tb_eff), lambda i: (0, i)),
        ),
        compiler_params=pltpu.CompilerParams(
            dimension_semantics=("parallel",),   # v7x: shard grid steps over 2 TCs
        ),
        cost_estimate=pl.CostEstimate(
            flops=128 * Bp, transcendentals=0, bytes_accessed=(8 + 16 + 16) * 4 * Bp
        ),
    )(params, init_flat)

    # Back to (B, 4, 4) row-major.
    return out_flat[:, :B].T.reshape(B, 4, 4)


def odom_pose_reference(r, t, init_c2w):
    """Pure-JAX single-pose math mirroring the PyTorch module."""
    r = r.astype(jnp.float32)
    t = t.astype(jnp.float32)
    init_c2w = init_c2w.astype(jnp.float32)
    qr, qi, qj, qk = r[0], r[1], r[2], r[3]
    two_s = 2.0 / jnp.sum(r * r)
    R = jnp.stack(
        [
            jnp.stack([1 - two_s * (qj * qj + qk * qk), two_s * (qi * qj - qk * qr), two_s * (qi * qk + qj * qr)]),
            jnp.stack([two_s * (qi * qj + qk * qr), 1 - two_s * (qi * qi + qk * qk), two_s * (qj * qk - qi * qr)]),
            jnp.stack([two_s * (qi * qk - qj * qr), two_s * (qj * qk + qi * qr), 1 - two_s * (qi * qi + qj * qj)]),
        ]
    )
    RT = jnp.concatenate([R, t[:, None]], axis=1)
    homo = jnp.array([[0.0, 0.0, 0.0, 1.0]], dtype=jnp.float32)
    RT = jnp.concatenate([RT, homo], axis=0)
    return RT @ init_c2w


def odom_pose_forward_batched(r, t, init_c2w, *, tb=8192, min_pallas_batch=1024,
                              force_pallas=False):
    """Batched forward. Dispatches to pure JAX for small batches (launch/DMA latency
    dwarfs ~128 flops/pose); uses the lane-dense tiled Pallas kernel for large B."""
    B = r.shape[0]
    if not force_pallas and B < min_pallas_batch:
        return jax.vmap(odom_pose_reference)(r, t, init_c2w)
    return _odom_pose_pallas(r, t, init_c2w, tb=tb)


def odom_pose_forward(r, t, init_c2w):
    """Single-pose module forward (matches OdomPose.forward): r (4,), t (3,), init (4,4).
    Pure JAX on purpose -- XLA fuses the 16-scalar result into downstream consumers."""
    # TODO(synk): for the per-frame module forward, inline this into the downstream
    # ray-transform kernel instead of a standalone Pallas launch.
    return odom_pose_reference(r, t, init_c2w)


if __name__ == "__main__":
    key = jax.random.PRNGKey(0)
    k_init, k_r, k_t, k_binit, k_br, k_bt = jax.random.split(key, 6)

    # ---- single-pose check (module semantics: r = [1,0,0,0], t = zeros, perturbed) ----
    r1 = jnp.array([1.0, 0.0, 0.0, 0.0], dtype=jnp.float32) \
        + 0.1 * jax.random.normal(k_r, (4,), dtype=jnp.float32)
    t1 = 0.1 * jax.random.normal(k_t, (3,), dtype=jnp.float32)
    init1 = jax.random.normal(k_init, (4, 4), dtype=jnp.float32)

    out1 = jax.block_until_ready(odom_pose_forward(r1, t1, init1))
    ref1 = odom_pose_reference(r1, t1, init1)
    np.testing.assert_allclose(np.asarray(out1), np.asarray(ref1), rtol=1e-5, atol=1e-5)

    # ---- batched Pallas-kernel check (small B; force the kernel path) ----
    B = 256
    rB = jnp.tile(jnp.array([1.0, 0.0, 0.0, 0.0], dtype=jnp.float32), (B, 1)) \
        + 0.1 * jax.random.normal(k_br, (B, 4), dtype=jnp.float32)
    tB = 0.1 * jax.random.normal(k_bt, (B, 3), dtype=jnp.float32)
    initB = jax.random.normal(k_binit, (B, 4, 4), dtype=jnp.float32)

    outB = jax.block_until_ready(
        odom_pose_forward_batched(rB, tB, initB, tb=8192, force_pallas=True))
    refB = jax.vmap(odom_pose_reference)(rB, tB, initB)
    np.testing.assert_allclose(np.asarray(outB), np.asarray(refB), rtol=1e-5, atol=1e-5)

    print("KERNEL_OK")
</pallas_src>

<mosaic_0001>
module attributes {stable_mosaic.version = 11 : i64} {
  func.func @odom_pose_kernel(%arg0: i32, %arg1: memref<8x256xf32, #tpu.memory_space<vmem>>, %arg2: memref<16x256xf32, #tpu.memory_space<vmem>>, %arg3: memref<16x256xf32, #tpu.memory_space<vmem>>) attributes {dimension_semantics = [#tpu.dimension_semantics<parallel>], iteration_bounds = array<i64: 1>, scalar_prefetch = 0 : i64, scratch_operands = 0 : i64, tpu.core_type = #tpu.core_type<tc>, window_params = [{transform_indices = @transform_0, window_bounds = array<i64: 8, 256>}, {transform_indices = @transform_1, window_bounds = array<i64: 16, 256>}, {transform_indices = @transform_2, window_bounds = array<i64: 16, 256>}]} {
    %c0 = arith.constant 0 : index
    %c0_0 = arith.constant 0 : index
    %0 = vector.load %arg1[%c0, %c0_0] : memref<8x256xf32, #tpu.memory_space<vmem>>, vector<8x256xf32>
    %c0_1 = arith.constant 0 : index
    %c0_2 = arith.constant 0 : index
    %1 = vector.load %arg2[%c0_1, %c0_2] : memref<16x256xf32, #tpu.memory_space<vmem>>, vector<16x256xf32>
    %2 = vector.extract_strided_slice %0 {offsets = [0, 0], sizes = [1, 256], strides = [1, 1]} : vector<8x256xf32> to vector<1x256xf32>
    %3 = vector.extract_strided_slice %0 {offsets = [1, 0], sizes = [1, 256], strides = [1, 1]} : vector<8x256xf32> to vector<1x256xf32>
    %4 = vector.extract_strided_slice %0 {offsets = [2, 0], sizes = [1, 256], strides = [1, 1]} : vector<8x256xf32> to vector<1x256xf32>
    %5 = vector.extract_strided_slice %0 {offsets = [3, 0], sizes = [1, 256], strides = [1, 1]} : vector<8x256xf32> to vector<1x256xf32>
    %6 = vector.extract_strided_slice %0 {offsets = [4, 0], sizes = [1, 256], strides = [1, 1]} : vector<8x256xf32> to vector<1x256xf32>
    %7 = vector.extract_strided_slice %0 {offsets = [5, 0], sizes = [1, 256], strides = [1, 1]} : vector<8x256xf32> to vector<1x256xf32>
    %8 = vector.extract_strided_slice %0 {offsets = [6, 0], sizes = [1, 256], strides = [1, 1]} : vector<8x256xf32> to vector<1x256xf32>
    %9 = arith.mulf %2, %2 : vector<1x256xf32>
    %10 = arith.mulf %3, %3 : vector<1x256xf32>
    %11 = arith.addf %9, %10 : vector<1x256xf32>
    %12 = arith.mulf %4, %4 : vector<1x256xf32>
    %13 = arith.addf %11, %12 : vector<1x256xf32>
    %14 = arith.mulf %5, %5 : vector<1x256xf32>
    %15 = arith.addf %13, %14 : vector<1x256xf32>
    %16 = tpu.reciprocal %15 : vector<1x256xf32> -> vector<1x256xf32>
    %cst = arith.constant 2.000000e+00 : f32
    %17 = vector.broadcast %cst : f32 to vector<1x256xf32>
    %18 = arith.mulf %17, %16 : vector<1x256xf32>
    %19 = arith.mulf %4, %4 : vector<1x256xf32>
    %20 = arith.mulf %5, %5 : vector<1x256xf32>
    %21 = arith.addf %19, %20 : vector<1x256xf32>
    %22 = arith.mulf %18, %21 : vector<1x256xf32>
    %cst_3 = arith.constant 1.000000e+00 : f32
    %23 = vector.broadcast %cst_3 : f32 to vector<1x256xf32>
    %24 = arith.subf %23, %22 : vector<1x256xf32>
    %25 = arith.mulf %3, %4 : vector<1x256xf32>
    %26 = arith.mulf %5, %2 : vector<1x256xf32>
    %27 = arith.subf %25, %26 : vector<1x256xf32>
    %28 = arith.mulf %18, %27 : vector<1x256xf32>
    %29 = arith.mulf %3, %5 : vector<1x256xf32>
    %30 = arith.mulf %4, %2 : vector<1x256xf32>
    %31 = arith.addf %29, %30 : vector<1x256xf32>
    %32 = arith.mulf %18, %31 : vector<1x256xf32>
    %33 = arith.mulf %3, %4 : vector<1x256xf32>
    %34 = arith.mulf %5, %2 : vector<1x256xf32>
    %35 = arith.addf %33, %34 : vector<1x256xf32>
    %36 = arith.mulf %18, %35 : vector<1x256xf32>
    %37 = arith.mulf %3, %3 : vector<1x256xf32>
    %38 = arith.mulf %5, %5 : vector<1x256xf32>
    %39 = arith.addf %37, %38 : vector<1x256xf32>
    %40 = arith.mulf %18, %39 : vector<1x256xf32>
    %cst_4 = arith.constant 1.000000e+00 : f32
    %41 = vector.broadcast %cst_4 : f32 to vector<1x256xf32>
    %42 = arith.subf %41, %40 : vector<1x256xf32>
    %43 = arith.mulf %4, %5 : vector<1x256xf32>
    %44 = arith.mulf %3, %2 : vector<1x256xf32>
    %45 = arith.subf %43, %44 : vector<1x256xf32>
    %46 = arith.mulf %18, %45 : vector<1x256xf32>
    %47 = arith.mulf %3, %5 : vector<1x256xf32>
    %48 = arith.mulf %4, %2 : vector<1x256xf32>
    %49 = arith.subf %47, %48 : vector<1x256xf32>
    %50 = arith.mulf %18, %49 : vector<1x256xf32>
    %51 = arith.mulf %4, %5 : vector<1x256xf32>
    %52 = arith.mulf %3, %2 : vector<1x256xf32>
    %53 = arith.addf %51, %52 : vector<1x256xf32>
    %54 = arith.mulf %18, %53 : vector<1x256xf32>
    %55 = arith.mulf %3, %3 : vector<1x256xf32>
    %56 = arith.mulf %4, %4 : vector<1x256xf32>
    %57 = arith.addf %55, %56 : vector<1x256xf32>
    %58 = arith.mulf %18, %57 : vector<1x256xf32>
    %cst_5 = arith.constant 1.000000e+00 : f32
    %59 = vector.broadcast %cst_5 : f32 to vector<1x256xf32>
    %60 = arith.subf %59, %58 : vector<1x256xf32>
    %61 = vector.extract_strided_slice %1 {offsets = [0, 0], sizes = [4, 256], strides = [1, 1]} : vector<16x256xf32> to vector<4x256xf32>
    %62 = vector.extract_strided_slice %1 {offsets = [4, 0], sizes = [4, 256], strides = [1, 1]} : vector<16x256xf32> to vector<4x256xf32>
    %63 = vector.extract_strided_slice %1 {offsets = [8, 0], sizes = [4, 256], strides = [1, 1]} : vector<16x256xf32> to vector<4x256xf32>
    %64 = vector.extract_strided_slice %1 {offsets = [12, 0], sizes = [4, 256], strides = [1, 1]} : vector<16x256xf32> to vector<4x256xf32>
    %65 = vector.broadcast %24 : vector<1x256xf32> to vector<4x256xf32>
    %66 = arith.mulf %65, %61 : vector<4x256xf32>
    %67 = vector.broadcast %28 : vector<1x256xf32> to vector<4x256xf32>
    %68 = arith.mulf %67, %62 : vector<4x256xf32>
    %69 = arith.addf %66, %68 : vector<4x256xf32>
    %70 = vector.broadcast %32 : vector<1x256xf32> to vector<4x256xf32>
    %71 = arith.mulf %70, %63 : vector<4x256xf32>
    %72 = arith.addf %69, %71 : vector<4x256xf32>
    %73 = vector.broadcast %6 : vector<1x256xf32> to vector<4x256xf32>
    %74 = arith.mulf %73, %64 : vector<4x256xf32>
    %75 = arith.addf %72, %74 : vector<4x256xf32>
    %76 = vector.broadcast %36 : vector<1x256xf32> to vector<4x256xf32>
    %77 = arith.mulf %76, %61 : vector<4x256xf32>
    %78 = vector.broadcast %42 : vector<1x256xf32> to vector<4x256xf32>
    %79 = arith.mulf %78, %62 : vector<4x256xf32>
    %80 = arith.addf %77, %79 : vector<4x256xf32>
    %81 = vector.broadcast %46 : vector<1x256xf32> to vector<4x256xf32>
    %82 = arith.mulf %81, %63 : vector<4x256xf32>
    %83 = arith.addf %80, %82 : vector<4x256xf32>
    %84 = vector.broadcast %7 : vector<1x256xf32> to vector<4x256xf32>
    %85 = arith.mulf %84, %64 : vector<4x256xf32>
    %86 = arith.addf %83, %85 : vector<4x256xf32>
    %87 = vector.broadcast %50 : vector<1x256xf32> to vector<4x256xf32>
    %88 = arith.mulf %87, %61 : vector<4x256xf32>
    %89 = vector.broadcast %54 : vector<1x256xf32> to vector<4x256xf32>
    %90 = arith.mulf %89, %62 : vector<4x256xf32>
    %91 = arith.addf %88, %90 : vector<4x256xf32>
    %92 = vector.broadcast %60 : vector<1x256xf32> to vector<4x256xf32>
    %93 = arith.mulf %92, %63 : vector<4x256xf32>
    %94 = arith.addf %91, %93 : vector<4x256xf32>
    %95 = vector.broadcast %8 : vector<1x256xf32> to vector<4x256xf32>
    %96 = arith.mulf %95, %64 : vector<4x256xf32>
    %97 = arith.addf %94, %96 : vector<4x256xf32>
    %98 = tpu.concatenate %75, %86, %97, %64 in 0 : vector<4x256xf32>, vector<4x256xf32>, vector<4x256xf32>, vector<4x256xf32> -> vector<16x256xf32>
    %c0_6 = arith.constant 0 : index
    %c0_7 = arith.constant 0 : index
    %99 = vector.load %arg3[%c0_6, %c0_7] : memref<16x256xf32, #tpu.memory_space<vmem>>, vector<16x256xf32>
    tpu.vector_store %arg3[%c0_6, %c0_7], %98 {strides = array<i32>} : memref<16x256xf32, #tpu.memory_space<vmem>>, vector<16x256xf32>,
    return
  }
  func.func @transform_0(%arg0: i32) -> (i32, i32) {
    %c0_i32 = arith.constant 0 : i32
    %c0_i32_0 = arith.constant 0 : i32
    return %c0_i32, %arg0 : i32, i32
  }
  func.func @transform_1(%arg0: i32) -> (i32, i32) {
    %c0_i32 = arith.constant 0 : i32
    %c0_i32_0 = arith.constant 0 : i32
    return %c0_i32, %arg0 : i32, i32
  }
  func.func @transform_2(%arg0: i32) -> (i32, i32) {
    %c0_i32 = arith.constant 0 : i32
    %c0_i32_0 = arith.constant 0 : i32
    return %c0_i32, %arg0 : i32, i32
  }
}

</mosaic_0001>

<bundles_post_ra>
// kernel: tpu_custom_call.1
= control target key start
LH: loop header
LB: loop body
LE: loop exit
PB: predicated region body
PF: predicated region fallthrough
CT: control target
= control target key end

     0   :  { %7 = vsyncpa [#allocation3], 0  ;;  %s666_s0 = inlined_call_operand.hbm [shape: f32[8,256], index: 0, kind: input, shape index: {}]   ;;  %s667_s1 = inlined_call_operand.hbm [shape: f32[16,256], index: 1, kind: input, shape index: {}]   ;;  %s668_s2 = inlined_call_operand.hbm [shape: f32[16,256], index: 2, kind: output, shape index: {}]  }
   0x1   :  { %8 = vsyncpa [#allocation6], 0 }
   0x2   :  { %9 = vsyncpa [#allocation4], 0  ;;  %s492_s9 = smov [#allocation2]   ;;  %s493_s11 = smov [#allocation5]  }
   0x3   :  { %s16_s10 = sshll.u32 %s492_s9, 4  ;;  %s25_s12 = sshll.u32 %s493_s11, 4  ;;  %s17_s10 = int_to_ptr.vmem [resolvable:$true] %s16_s10  ;;  %s26_s12 = int_to_ptr.vmem [resolvable:$true] %s25_s12 }
   0x4   :  { %s434_s13 = scalar_lea.vmem %s17_s10, 256  ;;  %p439_p1 = scmp.lt.s32.totalorder %s17_s10, %s17_s10 }
   0x5   :  { %p435_p0 = scmp.ne.s32.totalorder %s17_s10, %s434_s13  ;;  %p440_p2 = scmp.lt.s32.totalorder %s434_s13, %s434_s13 }
   0x7   :  { %p441_p3 = por %p440_p2, %p439_p1 }
   0x9   :  { %p442_p4 = pnand %p441_p3, %p435_p0 }
   0xb   :  { %445 = shalt.err (!%p442_p4)
}
   0xc   :  { %19 = dma.hbm_to_vmem [thread:$0]  %s666_s0, 256, %s17_s10, [#allocation3]  }
   0xd   :  { %s454_s16 = scalar_lea.vmem %s26_s12, 512  ;;  %p459_p6 = scmp.lt.s32.totalorder %s26_s12, %s26_s12 }
   0xe   :  { %p455_p5 = scmp.ne.s32.totalorder %s26_s12, %s454_s16  ;;  %p460_p7 = scmp.lt.s32.totalorder %s454_s16, %s454_s16 }
  0x10   :  { %p461_p8 = por %p460_p7, %p459_p6 }
  0x12   :  { %p462_p9 = pnand %p461_p8, %p455_p5 }
  0x14   :  { %465 = shalt.err (!%p462_p9)
}
  0x15   :  { %s494_s17 = smov 256   ;;  %s495_s18 = smov 16  }
  0x16   :  { %31 = dma.hbm_to_vmem [thread:$0]  %s667_s1, 512, %s26_s12, [#allocation6], %s494_s17, %s494_s17, %s495_s18  }
  0x17   :  { %486 = dma.done.wait [#allocation3], 256  }
  0x18   :  { %487 = vsyncadd [#allocation3], 4294967040 }
  0x19   :  { %488 = dma.done.wait [#allocation6], 512  }
  0x1a   :  { %489 = vsyncadd [#allocation6], 4294966784  ;;  %v210_v0 = vlaneseq  ;;  %v521_v1 = vld [vmem:[#allocation2] sm:$0xff]  ;;  %v532_v11 = vld [vmem:[#allocation2 + $0x8] sm:$0xff]  ;;  %vm390_vm0 = vcmask 1043456   ;;  %s496_s0 = smov [#allocation7]  }
  0x1b   :  { %v44_v3 = vmul.f32 %v521_v1, %v521_v1  ;;  %v88_v4 = vrot.slane %v521_v1, 5  ;;  %v116_v5 = vrot.slane %v521_v1, 6  ;;  %v160_v10 = vrot.slane %v521_v1, 7  ;;  %v544_v21 = vld [vmem:[#allocation5 + $0x10] sm:$0xff]  ;;  %v578_v57 = vld [vmem:[#allocation5 + $0x18] sm:$0xff]  ;;  %s404_s1 = sshll.u32 %s496_s0, 4  ;;  %s405_s1 = int_to_ptr.vmem [resolvable:$true] %s404_s1 }
  0x1c   :  { %v523_v2 = vshrl.u32 %v210_v0, 7  ;;  %v82_v12 = vrot.slane %v521_v1, 1  ;;  %v110_v16 = vrot.slane %v521_v1, 2  ;;  %v45_v20 = vmul.f32 %v532_v11, %v532_v11  ;;  %s466_s21 = scalar_lea.vmem %s405_s1, 512  ;;  %p471_p11 = scmp.lt.s32.totalorder %s405_s1, %s405_s1 }
  0x1d   :  { %v48_v8 = vrot.slane %v44_v3, 1  ;;  %v54_v9 = vrot.slane %v44_v3, 2  ;;  %v60_v14 = vrot.slane %v44_v3, 3  ;;  %v92_v15 = vmul.f32 %v88_v4, %v521_v1  ;;  %p467_p10 = scmp.ne.s32.totalorder %s405_s1, %s466_s21  ;;  %p472_p12 = scmp.lt.s32.totalorder %s466_s21, %s466_s21 }
  0x1e   :  { %v252_v6 = vsub.s32 4, %v523_v2  ;;  %v310_v7 = vsub.s32 5, %v523_v2  ;;  %v120_v17 = vmul.f32 %v116_v5, %v521_v1  ;;  %v164_v23 = vmul.f32 %v160_v10, %v521_v1 }
  0x1f   :  { %v535_v13 = vadd.f32 %v48_v8, %v44_v3  ;;  %v86_v24 = vmul.f32 %v82_v12, %v521_v1  ;;  %v549_v25 = vadd.f32 %v54_v9, %v44_v3  ;;  %v552_v26 = vsub.s32 0, %v523_v2  ;;  %p473_p13 = por %p472_p12, %p471_p11 }
  0x20   :  { %v253_v18 = vrot.slane %v521_v1, %v252_v6  ;;  %v311_v19 = vrot.slane %v521_v1, %v310_v7  ;;  %v368_v27 = vsub.s32 6, %v523_v2  ;;  %v96_v29 = vrot.slane %v92_v15, 2 }
  0x21   :  { %v58_v22 = vadd.f32 %v54_v9, %v535_v13  ;;  %v49_v30 = vrot.slane %v45_v20, 1  ;;  %v55_v31 = vrot.slane %v45_v20, 2  ;;  %v114_v32 = vmul.f32 %v110_v16, %v521_v1  ;;  %p474_p0 = pnand %p473_p13, %p467_p10 }
  0x22   :  { %v124_v33 = vrot.slane %v120_v17, 1  ;;  %v557_v34 = vmul.f32 %v253_v18, %v544_v21  ;;  %v560_v35 = vmul.f32 %v311_v19, %v544_v21  ;;  %v168_v36 = vrot.slane %v164_v23, 7 }
  0x23   :  { %v64_v28 = vadd.f32 %v60_v14, %v58_v22  ;;  %v562_v37 = vadd.f32 %v49_v30, %v45_v20  ;;  %v61_v38 = vrot.slane %v45_v20, 3  ;;  %v72_v39 = vrot.slane %v535_v13, 2 }
  0x24   :  { %v83_v40 = vrot.slane %v532_v11, 1  ;;  %v89_v41 = vrot.slane %v532_v11, 5  ;;  %v117_v42 = vrot.slane %v532_v11, 6  ;;  %v100_v43 = vsub.f32 %v86_v24, %v96_v29 }
  0x25   :  { %422 = vrcp.f32 %v64_v28  ;;  %v152_v44 = vrot.slane %v549_v25, 1  ;;  %v59_v45 = vadd.f32 %v55_v31, %v562_v37  ;;  %v161_v46 = vrot.slane %v532_v11, 7 }
  0x26   :  { %v128_v47 = vadd.f32 %v124_v33, %v114_v32  ;;  %v93_v48 = vmul.f32 %v89_v41, %v532_v11  ;;  %v111_v49 = vrot.slane %v532_v11, 2  ;;  %v121_v50 = vmul.f32 %v117_v42, %v532_v11 }
  0x27   :  { %v65_v51 = vadd.f32 %v61_v38, %v59_v45  ;;  %v165_v52 = vmul.f32 %v161_v46, %v532_v11  ;;  %v257_v53 = vrot.slane %v532_v11, %v252_v6  ;;  %v315_v54 = vrot.slane %v532_v11, %v310_v7 }
  0x28   :  { %v138_v55 = vadd.f32 %v96_v29, %v86_v24  ;;  %v262_v56 = vrot.slane %v557_v34, 4  ;;  %v87_v58 = vmul.f32 %v83_v40, %v532_v11  ;;  %v97_v59 = vrot.slane %v93_v48, 2 }
  0x29   :  { %v104_v60 = vrot.slane %v100_v43, 1  ;;  %v172_v61 = vsub.f32 %v86_v24, %v168_v36  ;;  %v320_v62 = vrot.slane %v560_v35, 4  ;;  %424 = vrcp.f32 %v65_v51 }
  0x2a   :  { %v132_v63 = vrot.slane %v128_v47, 1  ;;  %v115_v0 = vmul.f32 %v111_v49, %v532_v11  ;;  %v125_v2 = vrot.slane %v121_v50, 1  ;;  %v169_v3 = vrot.slane %v165_v52, 7 }
  0x2b   :  { %v583_v4 = vadd.f32 %v55_v31, %v45_v20  ;;  %v586_v5 = vmul.f32 %v257_v53, %v578_v57  ;;  %v589_v6 = vmul.f32 %v315_v54, %v578_v57  ;;  %v182_v7 = vsub.f32 %v114_v32, %v124_v33 }
  0x2c   :  { %v101_v8 = vsub.f32 %v87_v58, %v97_v59  ;;  %v129_v9 = vadd.f32 %v125_v2, %v115_v0  ;;  %v591_v10 = vadd.f32 %v97_v59, %v87_v58  ;;  %v192_v12 = vadd.f32 %v168_v36, %v86_v24 }
  0x2d   :  { %v142_v14 = vrot.slane %v138_v55, 1  ;;  %v176_v15 = vrot.slane %v172_v61, 2  ;;  %v73_v16 = vrot.slane %v562_v37, 2  ;;  %v173_v17 = vsub.f32 %v87_v58, %v169_v3 }
  0x2e   :  { %v369_v18 = vrot.slane %v521_v1, %v368_v27  ;;  %v595_v19 = vsub.f32 %v115_v0, %v125_v2  ;;  %v597_v20 = vadd.f32 %v169_v3, %v87_v58  ;;  %v373_v22 = vrot.slane %v532_v11, %v368_v27  ;;  %v40_v58 = vld [vmem:[#allocation5] sm:$0xff] }
  0x2f   :  { %v153_v23 = vrot.slane %v583_v4, 1  ;;  %v263_v25 = vrot.slane %v586_v5, 4  ;;  %v321_v28 = vrot.slane %v589_v6, 4  ;;  %v186_v24 = vrot.slane %v182_v7, 1 }
  0x30   :  { %v105_v30 = vrot.slane %v101_v8, 1  ;;  %v133_v31 = vrot.slane %v129_v9, 1  ;;  %v143_v32 = vrot.slane %v591_v10, 1  ;;  %v196_v33 = vrot.slane %v192_v12, 2 }
  0x31   :  { %v177_v36 = vrot.slane %v173_v17, 2  ;;  %v202_v38 = vrot.slane %v535_v13, 1  ;;  %v203_v40 = vrot.slane %v562_v37, 1  ;;  %v607_v11 = vmul.f32 %v369_v18, %v544_v21 }
  0x32   :  { %v423_v29 = vpop.eup %422  ;;  %v187_v27 = vrot.slane %v595_v19, 1  ;;  %v197_v41 = vrot.slane %v597_v20, 2  ;;  %v612_v42 = vmul.f32 %v373_v22, %v578_v57 }
  0x33   :  { %v68_v1 = vmul.f32 2.0, %v423_v29  ;;  %v378_v20 = vrot.slane %v607_v11, 4 }
  0x35   :  { %v76_v43 = vmul.f32 %v72_v39, %v68_v1  ;;  %v108_v45 = vmul.f32 %v104_v60, %v68_v1  ;;  %v136_v46 = vmul.f32 %v132_v63, %v68_v1  ;;  %v146_v47 = vmul.f32 %v142_v14, %v68_v1 }
  0x36   :  { %v156_v48 = vmul.f32 %v152_v44, %v68_v1  ;;  %v180_v49 = vmul.f32 %v176_v15, %v68_v1  ;;  %v190_v50 = vmul.f32 %v186_v24, %v68_v1  ;;  %v200_v13 = vmul.f32 %v196_v33, %v68_v1  ;;  %v425_v55 = vpop.eup %424 }
  0x37   :  { %v78_v51 = vsub.f32 1.0, %v76_v43  ;;  %v223_v52 = vrot.slane %v108_v45, %v552_v26  ;;  %v241_v53 = vrot.slane %v136_v46, %v552_v26  ;;  %v271_v54 = vrot.slane %v146_v47, %v552_v26 }
  0x38   :  { %v158_v59 = vsub.f32 1.0, %v156_v48  ;;  %v299_v61 = vrot.slane %v180_v49, %v552_v26  ;;  %v206_v39 = vmul.f32 %v202_v38, %v68_v1  ;;  %v329_v60 = vrot.slane %v190_v50, %v552_v26  ;;  %v41_v48 = vld [vmem:[#allocation5 + $0x8] sm:$0xff] }
  0x39   :  { %v213_v44 = vrot.slane %v78_v51, %v552_v26  ;;  %v228_v63 = vmul.f32 %v223_v52, %v40_v58  ;;  %v246_v0 = vmul.f32 %v241_v53, %v544_v21  ;;  %v276_v2 = vmul.f32 %v271_v54, %v40_v58 }
  0x3a   :  { %v281_v3 = vrot.slane %v158_v59, %v552_v26  ;;  %v304_v4 = vmul.f32 %v299_v61, %v544_v21  ;;  %v69_v7 = vmul.f32 2.0, %v425_v55  ;;  %v208_v8 = vsub.f32 1.0, %v206_v39 }
  0x3b   :  { %v218_v9 = vmul.f32 %v213_v44, %v40_v58  ;;  %v232_v10 = vrot.slane %v228_v63, 4  ;;  %v334_v12 = vmul.f32 %v329_v60, %v40_v58  ;;  %v339_v14 = vrot.slane %v200_v13, %v552_v26 }
  0x3c   :  { %v286_v15 = vmul.f32 %v281_v3, %v40_v58  ;;  %v77_v17 = vmul.f32 %v73_v16, %v69_v7  ;;  %v109_v18 = vmul.f32 %v105_v30, %v69_v7  ;;  %v137_v22 = vmul.f32 %v133_v31, %v69_v7 }
  0x3d   :  { %v236_v24 = vadd.f32 %v232_v10, %v218_v9  ;;  %v147_v29 = vmul.f32 %v143_v32, %v69_v7  ;;  %v157_v33 = vmul.f32 %v153_v23, %v69_v7  ;;  %v181_v1 = vmul.f32 %v177_v36, %v69_v7 }
  0x3e   :  { %v290_v38 = vrot.slane %v286_v15, 4  ;;  %v79_v43 = vsub.f32 1.0, %v77_v17  ;;  %v227_v45 = vrot.slane %v109_v18, %v552_v26  ;;  %v245_v46 = vrot.slane %v137_v22, %v552_v26 }
  0x3f   :  { %v248_v47 = vadd.f32 %v246_v0, %v236_v24  ;;  %v159_v49 = vsub.f32 1.0, %v157_v33  ;;  %v275_v50 = vrot.slane %v147_v29, %v552_v26  ;;  %v303_v16 = vrot.slane %v181_v1, %v552_v26 }
  0x40   :  { %v294_v30 = vadd.f32 %v290_v38, %v276_v2  ;;  %v217_v31 = vrot.slane %v79_v43, %v552_v26  ;;  %v229_v13 = vmul.f32 %v227_v45, %v41_v48  ;;  %v247_v23 = vmul.f32 %v245_v46, %v578_v57 }
  0x41   :  { %v266_v32 = vadd.f32 %v262_v56, %v248_v47  ;;  %v277_v36 = vmul.f32 %v275_v50, %v41_v48  ;;  %v285_v51 = vrot.slane %v159_v49, %v552_v26  ;;  %v305_v52 = vmul.f32 %v303_v16, %v578_v57 }
  0x42   :  { %v306_v53 = vadd.f32 %v304_v4, %v294_v30  ;;  %v219_v54 = vmul.f32 %v217_v31, %v41_v48  ;;  %v233_v55 = vrot.slane %v229_v13, 4  ;;  %v344_v59 = vmul.f32 %v339_v14, %v40_v58 }
  0x43   :  { %v287_v61 = vmul.f32 %v285_v51, %v41_v48  ;;  %v357_v39 = vrot.slane %v208_v8, %v552_v26  ;;  %v191_v60 = vmul.f32 %v187_v27, %v69_v7  ;;  %v201_v44 = vmul.f32 %v197_v41, %v69_v7 }
  0x44   :  { %v324_v34 = vadd.f32 %v320_v62, %v306_v53  ;;  %v237_v56 = vadd.f32 %v233_v55, %v219_v54  ;;  %v348_v63 = vrot.slane %v344_v59, 4  ;;  %v207_v0 = vmul.f32 %v203_v40, %v69_v7 }
  0x45   :  { %v291_v2 = vrot.slane %v287_v61, 4  ;;  %v362_v58 = vmul.f32 %v357_v39, %v544_v21  ;;  %v333_v3 = vrot.slane %v191_v60, %v552_v26  ;;  %v343_v4 = vrot.slane %v201_v44, %v552_v26 }
  0x46   :  { %v386_v19 = vrot.slane %v324_v34, 4  ;;  %v352_v27 = vadd.f32 %v348_v63, %v334_v12  ;;  %v209_v41 = vsub.f32 1.0, %v207_v0  ;;  %v249_v8 = vadd.f32 %v247_v23, %v237_v56 }
  0x47   :  { %v295_v35 = vadd.f32 %v291_v2, %v277_v36  ;;  %v335_v62 = vmul.f32 %v333_v3, %v41_v48  ;;  %v345_v9 = vmul.f32 %v343_v4, %v41_v48  ;;  %v379_v22 = vrot.slane %v612_v42, 4 }
  0x48   :  { %v391_v10 = vsel %vm390_vm0, %v266_v32, %v386_v19  ;;  %v364_v37 = vadd.f32 %v362_v58, %v352_v27  ;;  %v361_v40 = vrot.slane %v209_v41, %v552_v26  ;;  %v267_v12 = vadd.f32 %v263_v25, %v249_v8 }
  0x49   :  { %395 = vst [vmem:[#allocation7] sm:$0xff] %v391_v10  ;;  %v307_v7 = vadd.f32 %v305_v52, %v295_v35  ;;  %v349_v14 = vrot.slane %v345_v9, 4 }
  0x4a   :  { %v382_v15 = vadd.f32 %v378_v20, %v364_v37  ;;  %v363_v17 = vmul.f32 %v361_v40, %v578_v57 }
  0x4b   :  { %v325_v11 = vadd.f32 %v321_v28, %v307_v7  ;;  %v353_v18 = vadd.f32 %v349_v14, %v335_v62 }
  0x4c   :  { %v393_v24 = vsel %vm390_vm0, %v382_v15, %v544_v21 }
  0x4d   :  { %v387_v29 = vrot.slane %v325_v11, 4  ;;  %397 = vst [vmem:[#allocation7 + $0x10] sm:$0xff] %v393_v24  ;;  %v365_v26 = vadd.f32 %v363_v17, %v353_v18 }
  0x4f   :  { %v392_v33 = vsel %vm390_vm0, %v267_v12, %v387_v29  ;;  %v383_v1 = vadd.f32 %v379_v22, %v365_v26 }
  0x50   :  { %396 = vst [vmem:[#allocation7 + $0x8] sm:$0xff] %v392_v33 }
  0x51   :  { %v394_v5 = vsel %vm390_vm0, %v383_v1, %v578_v57 }
  0x52   :  { %398 = vst [vmem:[#allocation7 + $0x18] sm:$0xff] %v394_v5 }
  0x53   :  { %477 = shalt.err (!%p474_p0)
}
  0x54   :  { %410 = dma.vmem_to_hbm [thread:$0]  %s405_s1, 512, %s668_s2, [#allocation4], %s494_s17, %s494_s17, %s495_s18  }
  0x55   :  { %490 = dma.done.wait [#allocation4], 512  }
  0x56   :  { %491 = vsyncadd [#allocation4], 4294966784 }
  0x57   :  { %414 = vsyncpa [#allocation3], 1 }
  0x58   :  { %415 = vsyncpa [#allocation6], 1 }
  0x59   :  { %416 = vsyncpa [#allocation4], 1 }

</bundles_post_ra>
